<compile_context>
chip_gen: v6e
topology: v6e:2x2x1
jax: 0.10.0
libtpu: 0.0.40
codegen_flags: <defaults>
</compile_context>

<pallas_src>
import math
from functools import partial

import jax
import jax.numpy as jnp
from jax import lax
from jax.experimental import pallas as pl
from jax.experimental.pallas import tpu as pltpu


def _decoder_kernel(tgt_ref, mem_ref, wk_s_ref, bk_s_ref, wk_c_ref, bk_c_ref,
                    out_ref, *, num_layers):
    """One batch element: the full num_layers-deep decoder stack."""
    x = tgt_ref[0].astype(jnp.float32)          # (Lt, D)
    mem = mem_ref[0].astype(jnp.float32)        # (Lm, D)
    wk_s = wk_s_ref[...].astype(jnp.float32)    # (D, Kd)  (pre-transposed WK)
    bk_s = bk_s_ref[...].astype(jnp.float32)    # (1, Kd)
    wk_c = wk_c_ref[...].astype(jnp.float32)    # (D, Kd)
    bk_c = bk_c_ref[...].astype(jnp.float32)    # (1, Kd)

    def l2norm(v):
        # F.normalize(p=2, dim=-1, eps=1e-12)
        n = jnp.sqrt(jnp.sum(v * v, axis=-1, keepdims=True))
        return v / jnp.maximum(n, 1e-12)

    def project_norm(v, wk_t, bk):
        # l2norm( v @ WK^T + b ), WK already transposed to (D, Kd).
        p = jnp.dot(v, wk_t, preferred_element_type=jnp.float32) + bk
        return l2norm(p)

    def softmax_dot(qn, kn, value):
        # softmax(30 * qn @ kn^T) @ value, contracting the Kd axes directly
        # (no materialized transpose).
        logits = lax.dot_general(qn, kn, (((1,), (1,)), ((), ())),
                                 preferred_element_type=jnp.float32) * 30.0
        # |logits| <= 30 (cosine * temp): exp() cannot overflow in f32, so the
        # usual max-subtraction pass is unnecessary.
        e = jnp.exp(logits)
        aff = e * pl.reciprocal(jnp.sum(e, axis=-1, keepdims=True), approx=True)
        return jnp.dot(aff, value, preferred_element_type=jnp.float32)

    def norm_relu(y):
        # InstanceNorm1d(d_model): normalize each channel over the sequence axis.
        # Biased variance (one-pass E[y^2] - mean^2), eps=1e-5, no affine params.
        mean = jnp.mean(y, axis=0, keepdims=True)
        var = jnp.mean(y * y, axis=0, keepdims=True) - mean * mean
        yn = (y - mean) * lax.rsqrt(var + 1e-5)
        return jnp.maximum(yn, 0.0)

    # Cross-attention keys depend only on `memory` -> invariant across layers.
    kn_mem = project_norm(mem, wk_c, bk_c)                     # (Lm, Kd)

    # All layers share the same weights (_get_clone reuses the module instance).
    for _ in range(num_layers):
        # self-attention: q_in == kv == x, so one projection serves both Q and K
        qn_s = project_norm(x, wk_s, bk_s)                     # (Lt, Kd)
        x = norm_relu(x + softmax_dot(qn_s, qn_s, x))          # norm1 + relu
        # cross-attention against the (precomputed) memory keys
        qn_c = project_norm(x, wk_c, bk_c)                     # (Lt, Kd)
        x = norm_relu(x + softmax_dot(qn_c, kn_mem, mem))      # norm2 + relu

    out_ref[0] = x.astype(out_ref.dtype)


def transformer_decoder_forward(tgt, memory, params, num_layers=2):
    """tgt: (num_imgs, batch, d_model), memory: (mem_len, batch, d_model)
    -> (num_imgs, batch, d_model), matching the PyTorch sequence-first layout."""
    Lt, B, D = tgt.shape
    Lm, Bm, Dm = memory.shape
    assert B == Bm and D == Dm
    Kd = params["self_wk"].shape[0]

    # Kernel works batch-major; transposes + weight pre-transpose happen once
    # outside the kernel (cheap XLA ops on tiny tensors).
    x = jnp.transpose(tgt, (1, 0, 2))        # (B, Lt, D)
    mem = jnp.transpose(memory, (1, 0, 2))   # (B, Lm, D)
    wk_s_t = params["self_wk"].T             # (D, Kd)
    wk_c_t = params["cross_wk"].T            # (D, Kd)
    bk_s = params["self_bk"]                 # (1, Kd)
    bk_c = params["cross_bk"]                # (1, Kd)

    out = pl.pallas_call(
        partial(_decoder_kernel, num_layers=num_layers),
        out_shape=jax.ShapeDtypeStruct((B, Lt, D), tgt.dtype),
        grid=(B,),
        in_specs=[
            pl.BlockSpec((1, Lt, D), lambda b: (b, 0, 0)),
            pl.BlockSpec((1, Lm, D), lambda b: (b, 0, 0)),
            pl.BlockSpec((D, Kd), lambda b: (0, 0)),   # constant block -> stays resident
            pl.BlockSpec((1, Kd), lambda b: (0, 0)),
            pl.BlockSpec((D, Kd), lambda b: (0, 0)),
            pl.BlockSpec((1, Kd), lambda b: (0, 0)),
        ],
        out_specs=pl.BlockSpec((1, Lt, D), lambda b: (b, 0, 0)),
        compiler_params=pltpu.CompilerParams(dimension_semantics=("parallel",)),
    )(x, mem, wk_s_t, bk_s, wk_c_t, bk_c)

    return jnp.transpose(out, (1, 0, 2))     # back to (num_imgs, batch, d_model)


def reference_forward(tgt, memory, params, num_layers=2):
    """Pure-JAX reference (sequence-first layout, mirrors the PyTorch module)."""
    def l2n(v):
        return v / jnp.maximum(jnp.linalg.norm(v, axis=-1, keepdims=True), 1e-12)

    def attn(q_in, kv, wk, bk):
        q = jnp.einsum('lbd,kd->lbk', q_in, wk) + bk
        k = jnp.einsum('lbd,kd->lbk', kv, wk) + bk
        logits = jnp.einsum('qbk,sbk->bqs', l2n(q), l2n(k)) * 30.0
        aff = jax.nn.softmax(logits, axis=-1)
        return jnp.einsum('bqs,sbd->qbd', aff, kv)

    def inorm_relu(y):
        mean = jnp.mean(y, axis=0, keepdims=True)
        var = jnp.mean((y - mean) ** 2, axis=0, keepdims=True)
        return jnp.maximum((y - mean) / jnp.sqrt(var + 1e-5), 0.0)

    x = tgt
    for _ in range(num_layers):
        x = inorm_relu(x + attn(x, x, params["self_wk"], params["self_bk"]))
        x = inorm_relu(x + attn(x, memory, params["cross_wk"], params["cross_bk"]))
    return x


def init_params(key, d_model, key_feature_dim=128):
    """RelationUnit init: WK.weight ~ N(0, sqrt(2/out_features)), bias = 0.
    self_attn is the externally supplied MultiheadAttention (n_head=1, Kd=128);
    cross_attn belongs to the decoder layer. Both are shared by every layer."""
    k_self, k_cross = jax.random.split(key)
    std = math.sqrt(2.0 / key_feature_dim)
    return {
        "self_wk": std * jax.random.normal(k_self, (key_feature_dim, d_model), jnp.float32),
        "self_bk": jnp.zeros((1, key_feature_dim), jnp.float32),
        "cross_wk": std * jax.random.normal(k_cross, (key_feature_dim, d_model), jnp.float32),
        "cross_bk": jnp.zeros((1, key_feature_dim), jnp.float32),
    }


if __name__ == "__main__":
    num_imgs, batch, d_model = 8, 2, 32   # tgt sequence length, batch, feature dim
    mem_len = 16                          # memory sequence length
    num_layers = 2                        # small stack (all layers share weights)
    key_feature_dim = 128

    key = jax.random.PRNGKey(0)
    k_tgt, k_mem, k_par = jax.random.split(key, 3)
    tgt = jax.random.normal(k_tgt, (num_imgs, batch, d_model), jnp.float32)
    memory = jax.random.normal(k_mem, (mem_len, batch, d_model), jnp.float32)
    params = init_params(k_par, d_model, key_feature_dim)

    out = transformer_decoder_forward(tgt, memory, params, num_layers=num_layers)
    jax.block_until_ready(out)

    assert out.shape == (num_imgs, batch, d_model)
    assert bool(jnp.all(jnp.isfinite(out)))

    # Correctness vs. pure-JAX reference (tolerance covers the EUP approx
    # reciprocal used for the softmax denominator).
    ref = reference_forward(tgt, memory, params, num_layers=num_layers)
    assert bool(jnp.allclose(out, ref, atol=1e-2, rtol=1e-2))

    print("KERNEL_OK")
</pallas_src>

<mosaic_0001>
module attributes {stable_mosaic.version = 11 : i64} {
  func.func @_decoder_kernel(%arg0: i32, %arg1: memref<1x8x32xf32, #tpu.memory_space<vmem>>, %arg2: memref<1x16x32xf32, #tpu.memory_space<vmem>>, %arg3: memref<32x128xf32, #tpu.memory_space<vmem>>, %arg4: memref<1x128xf32, #tpu.memory_space<vmem>>, %arg5: memref<32x128xf32, #tpu.memory_space<vmem>>, %arg6: memref<1x128xf32, #tpu.memory_space<vmem>>, %arg7: memref<1x8x32xf32, #tpu.memory_space<vmem>>) attributes {dimension_semantics = [#tpu.dimension_semantics<parallel>], iteration_bounds = array<i64: 2>, scalar_prefetch = 0 : i64, scratch_operands = 0 : i64, tpu.core_type = #tpu.core_type<tc>, window_params = [{transform_indices = @transform_0, window_bounds = array<i64: 1, 8, 32>}, {transform_indices = @transform_1, window_bounds = array<i64: 1, 16, 32>}, {pipeline_mode = #tpu.pipeline_mode<synchronous>, transform_indices = @transform_2, window_bounds = array<i64: 32, 128>}, {pipeline_mode = #tpu.pipeline_mode<synchronous>, transform_indices = @transform_3, window_bounds = array<i64: 1, 128>}, {pipeline_mode = #tpu.pipeline_mode<synchronous>, transform_indices = @transform_4, window_bounds = array<i64: 32, 128>}, {pipeline_mode = #tpu.pipeline_mode<synchronous>, transform_indices = @transform_5, window_bounds = array<i64: 1, 128>}, {transform_indices = @transform_6, window_bounds = array<i64: 1, 8, 32>}]} {
    %c0 = arith.constant 0 : index
    %c0_0 = arith.constant 0 : index
    %c0_1 = arith.constant 0 : index
    %0 = vector.load %arg1[%c0, %c0_0, %c0_1] : memref<1x8x32xf32, #tpu.memory_space<vmem>>, vector<1x8x32xf32>
    %1 = vector.shape_cast %0 : vector<1x8x32xf32> to vector<8x32xf32>
    %c0_2 = arith.constant 0 : index
    %c0_3 = arith.constant 0 : index
    %c0_4 = arith.constant 0 : index
    %2 = vector.load %arg2[%c0_2, %c0_3, %c0_4] : memref<1x16x32xf32, #tpu.memory_space<vmem>>, vector<1x16x32xf32>
    %3 = vector.shape_cast %2 : vector<1x16x32xf32> to vector<16x32xf32>
    %c0_5 = arith.constant 0 : index
    %c0_6 = arith.constant 0 : index
    %4 = vector.load %arg3[%c0_5, %c0_6] : memref<32x128xf32, #tpu.memory_space<vmem>>, vector<32x128xf32>
    %c0_7 = arith.constant 0 : index
    %c0_8 = arith.constant 0 : index
    %5 = vector.load %arg4[%c0_7, %c0_8] : memref<1x128xf32, #tpu.memory_space<vmem>>, vector<1x128xf32>
    %c0_9 = arith.constant 0 : index
    %c0_10 = arith.constant 0 : index
    %6 = vector.load %arg5[%c0_9, %c0_10] : memref<32x128xf32, #tpu.memory_space<vmem>>, vector<32x128xf32>
    %c0_11 = arith.constant 0 : index
    %c0_12 = arith.constant 0 : index
    %7 = vector.load %arg6[%c0_11, %c0_12] : memref<1x128xf32, #tpu.memory_space<vmem>>, vector<1x128xf32>
    %cst = arith.constant dense<0.000000e+00> : vector<16x128xf32>
    %8 = tpu.matmul %3, %6, %cst {dimension_numbers = #tpu.dot_dimension_numbers<[1], [0], [0], [1], [0, 0, 1, 1], [], []>} : vector<16x32xf32>, vector<32x128xf32>, vector<16x128xf32> -> vector<16x128xf32>
    %9 = vector.broadcast %7 : vector<1x128xf32> to vector<16x128xf32>
    %10 = arith.addf %8, %9 : vector<16x128xf32>
    %11 = arith.mulf %10, %10 : vector<16x128xf32>
    %cst_13 = arith.constant dense<0.000000e+00> : vector<16xf32>
    %12 = vector.multi_reduction <add>, %11, %cst_13 [1] : vector<16x128xf32> to vector<16xf32>
    %13 = vector.shape_cast %12 : vector<16xf32> to vector<16x1xf32>
    %14 = math.sqrt %13 : vector<16x1xf32>
    %cst_14 = arith.constant 9.99999996E-13 : f32
    %15 = vector.broadcast %cst_14 : f32 to vector<16x1xf32>
    %16 = arith.maximumf %14, %15 : vector<16x1xf32>
    %17 = vector.broadcast %16 : vector<16x1xf32> to vector<16x128xf32>
    %18 = arith.divf %10, %17 : vector<16x128xf32>
    %cst_15 = arith.constant dense<0.000000e+00> : vector<8x128xf32>
    %19 = tpu.matmul %1, %4, %cst_15 {dimension_numbers = #tpu.dot_dimension_numbers<[1], [0], [0], [1], [0, 0, 1, 1], [], []>} : vector<8x32xf32>, vector<32x128xf32>, vector<8x128xf32> -> vector<8x128xf32>
    %20 = vector.broadcast %5 : vector<1x128xf32> to vector<8x128xf32>
    %21 = arith.addf %19, %20 : vector<8x128xf32>
    %22 = arith.mulf %21, %21 : vector<8x128xf32>
    %cst_16 = arith.constant dense<0.000000e+00> : vector<8xf32>
    %23 = vector.multi_reduction <add>, %22, %cst_16 [1] : vector<8x128xf32> to vector<8xf32>
    %24 = vector.shape_cast %23 : vector<8xf32> to vector<8x1xf32>
    %25 = math.sqrt %24 : vector<8x1xf32>
    %cst_17 = arith.constant 9.99999996E-13 : f32
    %26 = vector.broadcast %cst_17 : f32 to vector<8x1xf32>
    %27 = arith.maximumf %25, %26 : vector<8x1xf32>
    %28 = vector.broadcast %27 : vector<8x1xf32> to vector<8x128xf32>
    %29 = arith.divf %21, %28 : vector<8x128xf32>
    %cst_18 = arith.constant dense<0.000000e+00> : vector<8x8xf32>
    %30 = tpu.matmul %29, %29, %cst_18 {dimension_numbers = #tpu.dot_dimension_numbers<[1], [1], [0], [0], [0, 0, 1, 0], [], []>} : vector<8x128xf32>, vector<8x128xf32>, vector<8x8xf32> -> vector<8x8xf32>
    %cst_19 = arith.constant 3.000000e+01 : f32
    %31 = vector.broadcast %cst_19 : f32 to vector<8x8xf32>
    %32 = arith.mulf %30, %31 : vector<8x8xf32>
    %33 = math.exp %32 : vector<8x8xf32>
    %cst_20 = arith.constant dense<0.000000e+00> : vector<8xf32>
    %34 = vector.multi_reduction <add>, %33, %cst_20 [1] : vector<8x8xf32> to vector<8xf32>
    %35 = vector.shape_cast %34 : vector<8xf32> to vector<8x1xf32>
    %36 = tpu.reciprocal %35 {approx = true} : vector<8x1xf32> -> vector<8x1xf32>
    %37 = vector.broadcast %36 : vector<8x1xf32> to vector<8x8xf32>
    %38 = arith.mulf %33, %37 : vector<8x8xf32>
    %cst_21 = arith.constant dense<0.000000e+00> : vector<8x32xf32>
    %39 = tpu.matmul %38, %1, %cst_21 {dimension_numbers = #tpu.dot_dimension_numbers<[1], [0], [0], [1], [0, 0, 1, 1], [], []>} : vector<8x8xf32>, vector<8x32xf32>, vector<8x32xf32> -> vector<8x32xf32>
    %40 = arith.addf %1, %39 : vector<8x32xf32>
    %cst_22 = arith.constant dense<0.000000e+00> : vector<32xf32>
    %41 = vector.multi_reduction <add>, %40, %cst_22 [0] : vector<8x32xf32> to vector<32xf32>
    %42 = vector.shape_cast %41 : vector<32xf32> to vector<1x32xf32>
    %cst_23 = arith.constant 8.000000e+00 : f32
    %43 = vector.broadcast %cst_23 : f32 to vector<1x32xf32>
    %44 = arith.divf %42, %43 : vector<1x32xf32>
    %45 = arith.mulf %40, %40 : vector<8x32xf32>
    %cst_24 = arith.constant dense<0.000000e+00> : vector<32xf32>
    %46 = vector.multi_reduction <add>, %45, %cst_24 [0] : vector<8x32xf32> to vector<32xf32>
    %47 = vector.shape_cast %46 : vector<32xf32> to vector<1x32xf32>
    %cst_25 = arith.constant 8.000000e+00 : f32
    %48 = vector.broadcast %cst_25 : f32 to vector<1x32xf32>
    %49 = arith.divf %47, %48 : vector<1x32xf32>
    %50 = arith.mulf %44, %44 : vector<1x32xf32>
    %51 = arith.subf %49, %50 : vector<1x32xf32>
    %52 = vector.broadcast %44 : vector<1x32xf32> to vector<8x32xf32>
    %53 = arith.subf %40, %52 : vector<8x32xf32>
    %cst_26 = arith.constant 9.99999974E-6 : f32
    %54 = vector.broadcast %cst_26 : f32 to vector<1x32xf32>
    %55 = arith.addf %51, %54 : vector<1x32xf32>
    %56 = math.rsqrt %55 : vector<1x32xf32>
    %57 = vector.broadcast %56 : vector<1x32xf32> to vector<8x32xf32>
    %58 = arith.mulf %53, %57 : vector<8x32xf32>
    %cst_27 = arith.constant 0.000000e+00 : f32
    %59 = vector.broadcast %cst_27 : f32 to vector<8x32xf32>
    %60 = arith.maximumf %58, %59 : vector<8x32xf32>
    %cst_28 = arith.constant dense<0.000000e+00> : vector<8x128xf32>
    %61 = tpu.matmul %60, %6, %cst_28 {dimension_numbers = #tpu.dot_dimension_numbers<[1], [0], [0], [1], [0, 0, 1, 1], [], []>} : vector<8x32xf32>, vector<32x128xf32>, vector<8x128xf32> -> vector<8x128xf32>
    %62 = vector.broadcast %7 : vector<1x128xf32> to vector<8x128xf32>
    %63 = arith.addf %61, %62 : vector<8x128xf32>
    %64 = arith.mulf %63, %63 : vector<8x128xf32>
    %cst_29 = arith.constant dense<0.000000e+00> : vector<8xf32>
    %65 = vector.multi_reduction <add>, %64, %cst_29 [1] : vector<8x128xf32> to vector<8xf32>
    %66 = vector.shape_cast %65 : vector<8xf32> to vector<8x1xf32>
    %67 = math.sqrt %66 : vector<8x1xf32>
    %cst_30 = arith.constant 9.99999996E-13 : f32
    %68 = vector.broadcast %cst_30 : f32 to vector<8x1xf32>
    %69 = arith.maximumf %67, %68 : vector<8x1xf32>
    %70 = vector.broadcast %69 : vector<8x1xf32> to vector<8x128xf32>
    %71 = arith.divf %63, %70 : vector<8x128xf32>
    %cst_31 = arith.constant dense<0.000000e+00> : vector<8x16xf32>
    %72 = tpu.matmul %71, %18, %cst_31 {dimension_numbers = #tpu.dot_dimension_numbers<[1], [1], [0], [0], [0, 0, 1, 0], [], []>} : vector<8x128xf32>, vector<16x128xf32>, vector<8x16xf32> -> vector<8x16xf32>
    %cst_32 = arith.constant 3.000000e+01 : f32
    %73 = vector.broadcast %cst_32 : f32 to vector<8x16xf32>
    %74 = arith.mulf %72, %73 : vector<8x16xf32>
    %75 = math.exp %74 : vector<8x16xf32>
    %cst_33 = arith.constant dense<0.000000e+00> : vector<8xf32>
    %76 = vector.multi_reduction <add>, %75, %cst_33 [1] : vector<8x16xf32> to vector<8xf32>
    %77 = vector.shape_cast %76 : vector<8xf32> to vector<8x1xf32>
    %78 = tpu.reciprocal %77 {approx = true} : vector<8x1xf32> -> vector<8x1xf32>
    %79 = vector.broadcast %78 : vector<8x1xf32> to vector<8x16xf32>
    %80 = arith.mulf %75, %79 : vector<8x16xf32>
    %cst_34 = arith.constant dense<0.000000e+00> : vector<8x32xf32>
    %81 = tpu.matmul %80, %3, %cst_34 {dimension_numbers = #tpu.dot_dimension_numbers<[1], [0], [0], [1], [0, 0, 1, 1], [], []>} : vector<8x16xf32>, vector<16x32xf32>, vector<8x32xf32> -> vector<8x32xf32>
    %82 = arith.addf %60, %81 : vector<8x32xf32>
    %cst_35 = arith.constant dense<0.000000e+00> : vector<32xf32>
    %83 = vector.multi_reduction <add>, %82, %cst_35 [0] : vector<8x32xf32> to vector<32xf32>
    %84 = vector.shape_cast %83 : vector<32xf32> to vector<1x32xf32>
    %cst_36 = arith.constant 8.000000e+00 : f32
    %85 = vector.broadcast %cst_36 : f32 to vector<1x32xf32>
    %86 = arith.divf %84, %85 : vector<1x32xf32>
    %87 = arith.mulf %82, %82 : vector<8x32xf32>
    %cst_37 = arith.constant dense<0.000000e+00> : vector<32xf32>
    %88 = vector.multi_reduction <add>, %87, %cst_37 [0] : vector<8x32xf32> to vector<32xf32>
    %89 = vector.shape_cast %88 : vector<32xf32> to vector<1x32xf32>
    %cst_38 = arith.constant 8.000000e+00 : f32
    %90 = vector.broadcast %cst_38 : f32 to vector<1x32xf32>
    %91 = arith.divf %89, %90 : vector<1x32xf32>
    %92 = arith.mulf %86, %86 : vector<1x32xf32>
    %93 = arith.subf %91, %92 : vector<1x32xf32>
    %94 = vector.broadcast %86 : vector<1x32xf32> to vector<8x32xf32>
    %95 = arith.subf %82, %94 : vector<8x32xf32>
    %cst_39 = arith.constant 9.99999974E-6 : f32
    %96 = vector.broadcast %cst_39 : f32 to vector<1x32xf32>
    %97 = arith.addf %93, %96 : vector<1x32xf32>
    %98 = math.rsqrt %97 : vector<1x32xf32>
    %99 = vector.broadcast %98 : vector<1x32xf32> to vector<8x32xf32>
    %100 = arith.mulf %95, %99 : vector<8x32xf32>
    %cst_40 = arith.constant 0.000000e+00 : f32
    %101 = vector.broadcast %cst_40 : f32 to vector<8x32xf32>
    %102 = arith.maximumf %100, %101 : vector<8x32xf32>
    %cst_41 = arith.constant dense<0.000000e+00> : vector<8x128xf32>
    %103 = tpu.matmul %102, %4, %cst_41 {dimension_numbers = #tpu.dot_dimension_numbers<[1], [0], [0], [1], [0, 0, 1, 1], [], []>} : vector<8x32xf32>, vector<32x128xf32>, vector<8x128xf32> -> vector<8x128xf32>
    %104 = vector.broadcast %5 : vector<1x128xf32> to vector<8x128xf32>
    %105 = arith.addf %103, %104 : vector<8x128xf32>
    %106 = arith.mulf %105, %105 : vector<8x128xf32>
    %cst_42 = arith.constant dense<0.000000e+00> : vector<8xf32>
    %107 = vector.multi_reduction <add>, %106, %cst_42 [1] : vector<8x128xf32> to vector<8xf32>
    %108 = vector.shape_cast %107 : vector<8xf32> to vector<8x1xf32>
    %109 = math.sqrt %108 : vector<8x1xf32>
    %cst_43 = arith.constant 9.99999996E-13 : f32
    %110 = vector.broadcast %cst_43 : f32 to vector<8x1xf32>
    %111 = arith.maximumf %109, %110 : vector<8x1xf32>
    %112 = vector.broadcast %111 : vector<8x1xf32> to vector<8x128xf32>
    %113 = arith.divf %105, %112 : vector<8x128xf32>
    %cst_44 = arith.constant dense<0.000000e+00> : vector<8x8xf32>
    %114 = tpu.matmul %113, %113, %cst_44 {dimension_numbers = #tpu.dot_dimension_numbers<[1], [1], [0], [0], [0, 0, 1, 0], [], []>} : vector<8x128xf32>, vector<8x128xf32>, vector<8x8xf32> -> vector<8x8xf32>
    %cst_45 = arith.constant 3.000000e+01 : f32
    %115 = vector.broadcast %cst_45 : f32 to vector<8x8xf32>
    %116 = arith.mulf %114, %115 : vector<8x8xf32>
    %117 = math.exp %116 : vector<8x8xf32>
    %cst_46 = arith.constant dense<0.000000e+00> : vector<8xf32>
    %118 = vector.multi_reduction <add>, %117, %cst_46 [1] : vector<8x8xf32> to vector<8xf32>
    %119 = vector.shape_cast %118 : vector<8xf32> to vector<8x1xf32>
    %120 = tpu.reciprocal %119 {approx = true} : vector<8x1xf32> -> vector<8x1xf32>
    %121 = vector.broadcast %120 : vector<8x1xf32> to vector<8x8xf32>
    %122 = arith.mulf %117, %121 : vector<8x8xf32>
    %cst_47 = arith.constant dense<0.000000e+00> : vector<8x32xf32>
    %123 = tpu.matmul %122, %102, %cst_47 {dimension_numbers = #tpu.dot_dimension_numbers<[1], [0], [0], [1], [0, 0, 1, 1], [], []>} : vector<8x8xf32>, vector<8x32xf32>, vector<8x32xf32> -> vector<8x32xf32>
    %124 = arith.addf %102, %123 : vector<8x32xf32>
    %cst_48 = arith.constant dense<0.000000e+00> : vector<32xf32>
    %125 = vector.multi_reduction <add>, %124, %cst_48 [0] : vector<8x32xf32> to vector<32xf32>
    %126 = vector.shape_cast %125 : vector<32xf32> to vector<1x32xf32>
    %cst_49 = arith.constant 8.000000e+00 : f32
    %127 = vector.broadcast %cst_49 : f32 to vector<1x32xf32>
    %128 = arith.divf %126, %127 : vector<1x32xf32>
    %129 = arith.mulf %124, %124 : vector<8x32xf32>
    %cst_50 = arith.constant dense<0.000000e+00> : vector<32xf32>
    %130 = vector.multi_reduction <add>, %129, %cst_50 [0] : vector<8x32xf32> to vector<32xf32>
    %131 = vector.shape_cast %130 : vector<32xf32> to vector<1x32xf32>
    %cst_51 = arith.constant 8.000000e+00 : f32
    %132 = vector.broadcast %cst_51 : f32 to vector<1x32xf32>
    %133 = arith.divf %131, %132 : vector<1x32xf32>
    %134 = arith.mulf %128, %128 : vector<1x32xf32>
    %135 = arith.subf %133, %134 : vector<1x32xf32>
    %136 = vector.broadcast %128 : vector<1x32xf32> to vector<8x32xf32>
    %137 = arith.subf %124, %136 : vector<8x32xf32>
    %cst_52 = arith.constant 9.99999974E-6 : f32
    %138 = vector.broadcast %cst_52 : f32 to vector<1x32xf32>
    %139 = arith.addf %135, %138 : vector<1x32xf32>
    %140 = math.rsqrt %139 : vector<1x32xf32>
    %141 = vector.broadcast %140 : vector<1x32xf32> to vector<8x32xf32>
    %142 = arith.mulf %137, %141 : vector<8x32xf32>
    %cst_53 = arith.constant 0.000000e+00 : f32
    %143 = vector.broadcast %cst_53 : f32 to vector<8x32xf32>
    %144 = arith.maximumf %142, %143 : vector<8x32xf32>
    %cst_54 = arith.constant dense<0.000000e+00> : vector<8x128xf32>
    %145 = tpu.matmul %144, %6, %cst_54 {dimension_numbers = #tpu.dot_dimension_numbers<[1], [0], [0], [1], [0, 0, 1, 1], [], []>} : vector<8x32xf32>, vector<32x128xf32>, vector<8x128xf32> -> vector<8x128xf32>
    %146 = vector.broadcast %7 : vector<1x128xf32> to vector<8x128xf32>
    %147 = arith.addf %145, %146 : vector<8x128xf32>
    %148 = arith.mulf %147, %147 : vector<8x128xf32>
    %cst_55 = arith.constant dense<0.000000e+00> : vector<8xf32>
    %149 = vector.multi_reduction <add>, %148, %cst_55 [1] : vector<8x128xf32> to vector<8xf32>
    %150 = vector.shape_cast %149 : vector<8xf32> to vector<8x1xf32>
    %151 = math.sqrt %150 : vector<8x1xf32>
    %cst_56 = arith.constant 9.99999996E-13 : f32
    %152 = vector.broadcast %cst_56 : f32 to vector<8x1xf32>
    %153 = arith.maximumf %151, %152 : vector<8x1xf32>
    %154 = vector.broadcast %153 : vector<8x1xf32> to vector<8x128xf32>
    %155 = arith.divf %147, %154 : vector<8x128xf32>
    %cst_57 = arith.constant dense<0.000000e+00> : vector<8x16xf32>
    %156 = tpu.matmul %155, %18, %cst_57 {dimension_numbers = #tpu.dot_dimension_numbers<[1], [1], [0], [0], [0, 0, 1, 0], [], []>} : vector<8x128xf32>, vector<16x128xf32>, vector<8x16xf32> -> vector<8x16xf32>
    %cst_58 = arith.constant 3.000000e+01 : f32
    %157 = vector.broadcast %cst_58 : f32 to vector<8x16xf32>
    %158 = arith.mulf %156, %157 : vector<8x16xf32>
    %159 = math.exp %158 : vector<8x16xf32>
    %cst_59 = arith.constant dense<0.000000e+00> : vector<8xf32>
    %160 = vector.multi_reduction <add>, %159, %cst_59 [1] : vector<8x16xf32> to vector<8xf32>
    %161 = vector.shape_cast %160 : vector<8xf32> to vector<8x1xf32>
    %162 = tpu.reciprocal %161 {approx = true} : vector<8x1xf32> -> vector<8x1xf32>
    %163 = vector.broadcast %162 : vector<8x1xf32> to vector<8x16xf32>
    %164 = arith.mulf %159, %163 : vector<8x16xf32>
    %cst_60 = arith.constant dense<0.000000e+00> : vector<8x32xf32>
    %165 = tpu.matmul %164, %3, %cst_60 {dimension_numbers = #tpu.dot_dimension_numbers<[1], [0], [0], [1], [0, 0, 1, 1], [], []>} : vector<8x16xf32>, vector<16x32xf32>, vector<8x32xf32> -> vector<8x32xf32>
    %166 = arith.addf %144, %165 : vector<8x32xf32>
    %cst_61 = arith.constant dense<0.000000e+00> : vector<32xf32>
    %167 = vector.multi_reduction <add>, %166, %cst_61 [0] : vector<8x32xf32> to vector<32xf32>
    %168 = vector.shape_cast %167 : vector<32xf32> to vector<1x32xf32>
    %cst_62 = arith.constant 8.000000e+00 : f32
    %169 = vector.broadcast %cst_62 : f32 to vector<1x32xf32>
    %170 = arith.divf %168, %169 : vector<1x32xf32>
    %171 = arith.mulf %166, %166 : vector<8x32xf32>
    %cst_63 = arith.constant dense<0.000000e+00> : vector<32xf32>
    %172 = vector.multi_reduction <add>, %171, %cst_63 [0] : vector<8x32xf32> to vector<32xf32>
    %173 = vector.shape_cast %172 : vector<32xf32> to vector<1x32xf32>
    %cst_64 = arith.constant 8.000000e+00 : f32
    %174 = vector.broadcast %cst_64 : f32 to vector<1x32xf32>
    %175 = arith.divf %173, %174 : vector<1x32xf32>
    %176 = arith.mulf %170, %170 : vector<1x32xf32>
    %177 = arith.subf %175, %176 : vector<1x32xf32>
    %178 = vector.broadcast %170 : vector<1x32xf32> to vector<8x32xf32>
    %179 = arith.subf %166, %178 : vector<8x32xf32>
    %cst_65 = arith.constant 9.99999974E-6 : f32
    %180 = vector.broadcast %cst_65 : f32 to vector<1x32xf32>
    %181 = arith.addf %177, %180 : vector<1x32xf32>
    %182 = math.rsqrt %181 : vector<1x32xf32>
    %183 = vector.broadcast %182 : vector<1x32xf32> to vector<8x32xf32>
    %184 = arith.mulf %179, %183 : vector<8x32xf32>
    %cst_66 = arith.constant 0.000000e+00 : f32
    %185 = vector.broadcast %cst_66 : f32 to vector<8x32xf32>
    %186 = arith.maximumf %184, %185 : vector<8x32xf32>
    %c0_67 = arith.constant 0 : index
    %c0_68 = arith.constant 0 : index
    %c0_69 = arith.constant 0 : index
    %187 = vector.load %arg7[%c0_67, %c0_68, %c0_69] : memref<1x8x32xf32, #tpu.memory_space<vmem>>, vector<1x8x32xf32>
    %188 = vector.shape_cast %187 : vector<1x8x32xf32> to vector<8x32xf32>
    %189 = vector.shape_cast %186 : vector<8x32xf32> to vector<1x8x32xf32>
    tpu.vector_store %arg7[%c0_67, %c0_68, %c0_69], %189 {strides = array<i32>} : memref<1x8x32xf32, #tpu.memory_space<vmem>>, vector<1x8x32xf32>,
    return
  }
  func.func @transform_0(%arg0: i32) -> (i32, i32, i32) {
    %c0_i32 = arith.constant 0 : i32
    %c0_i32_0 = arith.constant 0 : i32
    %c0_i32_1 = arith.constant 0 : i32
    return %arg0, %c0_i32, %c0_i32_0 : i32, i32, i32
  }
  func.func @transform_1(%arg0: i32) -> (i32, i32, i32) {
    %c0_i32 = arith.constant 0 : i32
    %c0_i32_0 = arith.constant 0 : i32
    %c0_i32_1 = arith.constant 0 : i32
    return %arg0, %c0_i32, %c0_i32_0 : i32, i32, i32
  }
  func.func @transform_2(%arg0: i32) -> (i32, i32) {
    %c0_i32 = arith.constant 0 : i32
    %c0_i32_0 = arith.constant 0 : i32
    %c0_i32_1 = arith.constant 0 : i32
    return %c0_i32, %c0_i32_0 : i32, i32
  }
  func.func @transform_3(%arg0: i32) -> (i32, i32) {
    %c0_i32 = arith.constant 0 : i32
    %c0_i32_0 = arith.constant 0 : i32
    %c0_i32_1 = arith.constant 0 : i32
    return %c0_i32, %c0_i32_0 : i32, i32
  }
  func.func @transform_4(%arg0: i32) -> (i32, i32) {
    %c0_i32 = arith.constant 0 : i32
    %c0_i32_0 = arith.constant 0 : i32
    %c0_i32_1 = arith.constant 0 : i32
    return %c0_i32, %c0_i32_0 : i32, i32
  }
  func.func @transform_5(%arg0: i32) -> (i32, i32) {
    %c0_i32 = arith.constant 0 : i32
    %c0_i32_0 = arith.constant 0 : i32
    %c0_i32_1 = arith.constant 0 : i32
    return %c0_i32, %c0_i32_0 : i32, i32
  }
  func.func @transform_6(%arg0: i32) -> (i32, i32, i32) {
    %c0_i32 = arith.constant 0 : i32
    %c0_i32_0 = arith.constant 0 : i32
    %c0_i32_1 = arith.constant 0 : i32
    return %arg0, %c0_i32, %c0_i32_0 : i32, i32, i32
  }
}

</mosaic_0001>

<bundles_post_ra>
// kernel: tpu_custom_call.1
= control target key start
LH: loop header
LB: loop body
LE: loop exit
PB: predicated region body
PF: predicated region fallthrough
CT: control target
= control target key end

     0   :  { %s2594_s0 = inlined_call_operand.hbm [shape: f32[2,8,32], index: 0, kind: input, shape index: {}]   ;;  %s2595_s1 = inlined_call_operand.hbm [shape: f32[2,16,32], index: 1, kind: input, shape index: {}]   ;;  %s2596_s2 = inlined_call_operand.hbm [shape: f32[32,128], index: 2, kind: input, shape index: {}]   ;;  %s2597_s3 = inlined_call_operand.vmem [shape: f32[1,128], index: 3, kind: input, shape index: {}]   ;;  %s2598_s4 = inlined_call_operand.hbm [shape: f32[32,128], index: 4, kind: input, shape index: {}]   ;;  %s2599_s5 = inlined_call_operand.vmem [shape: f32[1,128], index: 5, kind: input, shape index: {}]   ;;  %s2600_s6 = inlined_call_operand.hbm [shape: f32[2,8,32], index: 6, kind: output, shape index: {}]  }
   0x1   :  { %2606 = sst [smem:[#allocation16_spill]] %s2594_s0 }
   0x2   :  { %2607 = sst [smem:[#allocation17_spill]] %s2596_s2 }
   0x3   :  { %11 = vsyncpa [#allocation3], 0 }
   0x4   :  { %13 = vsyncpa [#allocation3 + $0x1], 0 }
   0x5   :  { %14 = vsyncpa [#allocation6], 0 }
   0x6   :  { %16 = vsyncpa [#allocation6 + $0x1], 0 }
   0x7   :  { %17 = vsyncpa [#allocation9], 0 }
   0x8   :  { %18 = vsyncpa [#allocation4], 0 }
   0x9   :  { %20 = vsyncpa [#allocation4 + $0x1], 0  ;;  %s2183_s21 = smov 0   ;;  %s2185_s22 = smov 0  }
   0xa   :  { %s2187_s23 = smov 0   ;;  %s2189_s24 = smov 0  }
   0xb LB: > { %s2204_s25 = sadd.s32 4294967295, %s2137_s24   ;;  %s1647_s26 = sadd.s32 4294967294, %s2137_s24   ;;  %s2137_s24 = sphi %s2189_s24, %s2631_s24   ;;  %s2133_s23 = sphi %s2187_s23, %s2630_s23   ;;  %s2129_s22 = sphi %s2185_s22, %s2629_s22   ;;  %s2125_s21 = sphi %s2183_s21, %s2628_s21  }
   0xc   : > { %p46_p0 = scmp.ne.s32.totalorder %s2129_s22, %s2125_s21  ;;  %p2603_p1 = scmp.eq.s32.totalorder %s2204_s25, 0 }
   0xd   : > { %p180_p2 = scmp.eq.s32.totalorder %s2204_s25, 1  ;;  %p186_p3 = scmp.eq.s32.totalorder %s1647_s26, 1 }
   0xe   : > { %p2213_p4 = por %p2603_p1, %p46_p0  ;;  %p1648_p5 = scmp.ge.s32.totalorder %s2137_s24, 1 }
   0xf   : > { %p2218_p6 = por %p186_p3, %p46_p0  ;;  %p193_p7 = scmp.lt.s32.totalorder %s2137_s24, 3 }
  0x10   : > { %s2608_s27 = scalar_select %p2213_p4, 1, 0 }
  0x11   : > { %s2609_s28 = scalar_select %p2218_p6, 1, 0 }
  0x12   : > { %p2223_p8 = pnand %p1648_p5, %p193_p7  ;;  %s2139_s30 = smov [#allocation7]  }
  0x13   : > { %s205_s7 = sshll.u32 %s2139_s30, 4  ;;  %s2140_s9 = smov [#allocation8]   ;;  %s206_s7 = int_to_ptr.vmem [resolvable:$true] %s205_s7 }
  0x14   : > { %p1843_p9 = pneg %p2223_p8  ;;  %s221_s10 = sshll.u32 %s2140_s9, 4  ;;  %s222_s10 = int_to_ptr.vmem [resolvable:$true] %s221_s10 }
  0x15   : > { %s1964_s11 = scalar_lea.vmem %s206_s7, 512  ;;  %p1972_p5 = scmp.lt.s32.totalorder %s206_s7, %s206_s7 }
  0x16   : > { %p2232_p11 = pnand %p1843_p9, %p2603_p1  ;;  %p1965_p13 = scmp.ne.s32.totalorder %s206_s7, %s1964_s11 }
  0x17   : > { %p1973_p7 = scmp.lt.s32.totalorder %s1964_s11, %s1964_s11 }
  0x18   : > { %p1955_p12 = pneg %p2232_p11 }
  0x19   : > { %p1974_p10 = por %p1973_p7, %p1972_p5 }
  0x1a   : > { %p1967_p0 = pnand %p1965_p13, %p1955_p12 }
  0x1c   : > { %p1968_p3 = pneg %p1967_p0 }
  0x1e   : > { %p1975_p9 = pnand %p1974_p10, %p1968_p3 }
  0x20   : > { %1978 = shalt.err (!%p1975_p9)
}
  0x21   : > { %s2601_s12 = smov 128   ;;  %s2602_s13 = smov 8  }
  0x22   : > { %s2612_s2 = sld [smem:[#allocation17_spill]]  ;;  %s1990_s16 = scalar_lea.vmem %s222_s10, 512 }
  0x23   : > { %p1991_p13 = scmp.ne.s32.totalorder %s222_s10, %s1990_s16  ;;  %p1998_p10 = scmp.lt.s32.totalorder %s222_s10, %s222_s10 }
  0x24   : > { %p1999_p3 = scmp.lt.s32.totalorder %s1990_s16, %s1990_s16 }
  0x25   : > { %p1993_p0 = pnand %p1991_p13, %p1955_p12 }
  0x26   : > { %p2000_p7 = por %p1999_p3, %p1998_p10 }
  0x27   : > { %p1994_p5 = pneg %p1993_p0 }
  0x28   : > { %1846 = dma.hbm_to_vmem [thread:$0]  (!%p2232_p11), %s2612_s2, 512, %s206_s7, [#allocation6], %s2601_s12, %s2601_s12, %s2602_s13  }
  0x29   : > { %p2001_p9 = pnand %p2000_p7, %p1994_p5 }
  0x2b   : > { %2004 = shalt.err (!%p2001_p9)
}
  0x2c   : > { %1849 = dma.hbm_to_vmem [thread:$0]  (!%p2232_p11), %s2598_s4, 512, %s222_s10, [#allocation9], %s2601_s12, %s2601_s12, %s2602_s13  }
  0x2d   : > { %s2261_s19 = sadd.s32 1, %s2137_s24   ;;  %s33_s20 = sadd.s32 1, %s2133_s23 }
  0x2e   : > { %s30_s26 = ssub.s32 %s2137_s24, %s2261_s19  ;;  %p40_p12 = scmp.ne.s32.totalorder %s2133_s23, %s2129_s22 }
  0x2f   : > { %p31_p13 = scmp.eq.s32.totalorder %s30_s26, 0  ;;  %p41_p0 = scmp.eq.s32.totalorder %s2137_s24, 0 }
  0x30   : > { %p2271_p5 = por %p180_p2, %p40_p12  ;;  %p1863_p10 = scmp.lt.s32.totalorder %s2137_s24, 2 }
  0x31   : > { %s2277_s7 = scalar_select %p31_p13, %s2133_s23, %s33_s20  }
  0x32   : > { %s2613_s30 = scalar_select %p2271_p5, 1, 0 }
  0x33   : > { %p42_p3 = por %p41_p0, %p40_p12  ;;  %s2280_s8 = sand.u32 1, %s2133_s23  }
  0x34   : > { %s1652_s9 = sshll.u32 %s2280_s8, 3  ;;  %s1653_s10 = sshll.u32 %s2137_s24, 7 }
  0x35   : > { %s2614_s0 = sld [smem:[#allocation16_spill]]  ;;  %s242_s16 = scalar_lea.vmem [#allocation2], %s1652_s9 }
  0x36   : > { %s249_s17 = sshll.u32 %s242_s16, 4  ;;  %p2291_p2 = pnand %p1863_p10, %p42_p3  ;;  %s2289_s17 = int_to_ptr.vmem [resolvable:$true] %s249_s17 }
  0x37   : > { %s239_s12 = scalar_lea.sflag [#allocation3], %s2280_s8 }
  0x38   : > { %p2007_p7 = pneg %p2291_p2 }
  0x3b   : > { %s2287_s15 = scalar_lea.hbm %s2614_s0, %s1653_s10  ;;  %s2010_s11 = scalar_lea.hbm %s2614_s0, 256 }
  0x3c   : > { %s2005_s13 = scalar_lea.hbm %s2287_s15, 128  ;;  %p2011_p13 = scmp.lt.s32.totalorder %s2287_s15, %s2614_s0 }
  0x3d   : > { %p2006_p11 = scmp.ne.s32.totalorder %s2287_s15, %s2005_s13  ;;  %p2012_p0 = scmp.lt.s32.totalorder %s2010_s11, %s2005_s13 }
  0x3f   : > { %p2008_p9 = pnand %p2007_p7, %p2006_p11  ;;  %p2013_p10 = por %p2012_p0, %p2011_p13 }
  0x41   : > { %p2009_p12 = pneg %p2008_p9 }
  0x43   : > { %p2014_p3 = pnand %p2013_p10, %p2009_p12 }
  0x45   : > { %2017 = shalt.err (!%p2014_p3)
}
  0x46   : > { %s2018_s26 = scalar_lea.vmem %s2289_s17, 128  ;;  %s2143_s9 = smov [#allocation2]  }
  0x47   : > { %p2019_p1 = scmp.ne.s32.totalorder %s2289_s17, %s2018_s26  ;;  %s2023_s10 = sshll.u32 %s2143_s9, 4  ;;  %s2024_s10 = int_to_ptr.vmem [resolvable:$false] %s2023_s10 }
  0x48   : > { %s2025_s20 = scalar_lea.vmem %s2024_s10, 256  ;;  %p2026_p6 = scmp.lt.s32.totalorder %s2289_s17, %s2024_s10 }
  0x49   : > { %p2021_p11 = pnand %p2019_p1, %p2007_p7  ;;  %p2027_p5 = scmp.lt.s32.totalorder %s2025_s20, %s2018_s26 }
  0x4b   : > { %p2022_p9 = pneg %p2021_p11  ;;  %p2028_p4 = por %p2027_p5, %p2026_p6 }
  0x4d   : > { %p2029_p13 = pnand %p2028_p4, %p2022_p9 }
  0x4f   : > { %2032 = shalt.err (!%p2029_p13)
}
  0x50   : > { %1853 = dma.hbm_to_vmem [thread:$0]  (!%p2291_p2), %s2287_s15, 128, %s2289_s17, %s239_s12  }
  0x51   : > { %s2616_s13 = sshll.u32 %s2280_s8, 4  ;;  %s1679_s16 = sshll.u32 %s2137_s24, 8 }
  0x52   : > { %s260_s11 = scalar_lea.vmem [#allocation5], %s2616_s13  ;;  %s2330_s26 = scalar_lea.hbm %s2595_s1, %s1679_s16 }
  0x53   : > { %s267_s14 = sshll.u32 %s260_s11, 4  ;;  %s2617_s10 = sand.u32 1, %s2137_s24   ;;  %s2324_s14 = int_to_ptr.vmem [resolvable:$true] %s267_s14 }
  0x54   : > { %s257_s0 = scalar_lea.sflag [#allocation6], %s2617_s10  ;;  %s2033_s2 = scalar_lea.hbm %s2330_s26, 256 }
  0x55   : > { %p2034_p1 = scmp.ne.s32.totalorder %s2330_s26, %s2033_s2  ;;  %s2038_s15 = scalar_lea.hbm %s2595_s1, 512 }
  0x56   : > { %p2039_p5 = scmp.lt.s32.totalorder %s2330_s26, %s2595_s1  ;;  %p2040_p12 = scmp.lt.s32.totalorder %s2038_s15, %s2033_s2 }
  0x57   : > { %p2036_p4 = pnand %p2034_p1, %p2007_p7 }
  0x58   : > { %p2041_p0 = por %p2040_p12, %p2039_p5 }
  0x59   : > { %p2037_p6 = pneg %p2036_p4 }
  0x5b   : > { %p2042_p10 = pnand %p2041_p0, %p2037_p6 }
  0x5d   : > { %2045 = shalt.err (!%p2042_p10)
}
  0x5e   : > { %s2046_s11 = scalar_lea.vmem %s2324_s14, 256  ;;  %s2144_s16 = smov [#allocation5]  }
  0x5f   : > { %p2047_p3 = scmp.ne.s32.totalorder %s2324_s14, %s2046_s11  ;;  %s2051_s9 = sshll.u32 %s2144_s16, 4  ;;  %s2052_s9 = int_to_ptr.vmem [resolvable:$false] %s2051_s9 }
  0x60   : > { %s2053_s20 = scalar_lea.vmem %s2052_s9, 512  ;;  %p2054_p13 = scmp.lt.s32.totalorder %s2324_s14, %s2052_s9 }
  0x61   : > { %p2049_p11 = pnand %p2047_p3, %p2007_p7  ;;  %p2055_p1 = scmp.lt.s32.totalorder %s2053_s20, %s2046_s11 }
  0x63   : > { %p2050_p9 = pneg %p2049_p11  ;;  %p2056_p4 = por %p2055_p1, %p2054_p13 }
  0x65   : > { %p2057_p5 = pnand %p2056_p4, %p2050_p9 }
  0x67   : > { %2060 = shalt.err (!%p2057_p5)
}
  0x68   : > { %s2618_s2 = smov 8   ;;  %s2619_s10 = smov 128  }
  0x69   : > { %1856 = dma.hbm_to_vmem [thread:$0]  (!%p2291_p2), %s2330_s26, 256, %s2324_s14, %s257_s0, %s2619_s10, %s2619_s10, %s2618_s2  }
  0x6a   : > { %279 = sbr.rel (%p2223_p8) target bundleno = 4034 (0xfc2), region = 44  ;;  %s2362_s12 = sand.u32 (!%p2223_p8), 1, %s2129_s22  }
  0x6b   : > { %s1658_s8 = sshll.u32 (!%p2223_p8), %s2362_s12, 3  ;;  %s282_s15 = scalar_lea.sflag (!%p2223_p8), [#allocation3], %s2362_s12 }
  0x6c   : > { %s2368_s18 = scalar_lea.vmem (!%p2223_p8), [#allocation2], %s1658_s8  ;;  %p2620_p7 = scmp.ne.s32.totalorder (!%p2223_p8), %s2608_s27, 0 }
  0x6f   : > { %2104 = dma.done.wait (%p2620_p7), %s282_s15, 128  }
  0x70   : > { %2106 = vsyncadd (%p2620_p7), %s282_s15, 4294967168  ;;  %s290_s0 = sand.u32 1, %s2204_s25   ;;  %s1659_s29 = sshll.u32 %s2362_s12, 4 }
  0x71   : > { %s291_s14 = scalar_lea.sflag [#allocation6], %s290_s0  ;;  %s2376_s26 = scalar_lea.vmem [#allocation5], %s1659_s29 }
  0x72   : > { %2108 = dma.done.wait (%p2620_p7), %s291_s14, 256  }
  0x73   : > { %2110 = vsyncadd (%p2620_p7), %s291_s14, 4294967040  ;;  %p2621_p8 = scmp.eq.s32.totalorder %s2204_s25, 0 }
  0x75   : > { %2112 = dma.done.wait (%p2621_p8), [#allocation6], 512   ;;  %p2622_p2 = pmov %p2621_p8 }
  0x77   : > { %2114 = vsyncadd (%p2622_p2), [#allocation6], 4294966784  ;;  %p2623_p6 = pmov %p2622_p2 }
  0x78   : > { %p2624_p12 = pmov %p2622_p2 }
  0x79   : > { %2116 = dma.done.wait (%p2623_p6), [#allocation9], 512  }
  0x7a   : > { %2118 = vsyncadd (%p2624_p12), [#allocation9], 4294966784  ;;  %v2145_v0 = vmov 0.0   ;;  %vm2146_vm0 = vmmov 0   ;;  %v2393_v1 = vld [vmem:[#allocation7 + $0x18] sm:$0xff]  ;;  %v2395_v2 = vld [vmem:[#allocation7 + $0x10] sm:$0xff] }
  0x7b   : > { %1737 = vmatprep.subr.mxu1 %v2145_v0  ;;  %1745 = vmatprep.mubr.msk.f32.mxu1 %vm2146_vm0, %v2145_v0  ;;  %v2398_v3 = vld [vmem:[#allocation8 + $0x18] sm:$0xff]  ;;  %v2401_v4 = vld [vmem:[#allocation7 + $0x8] sm:$0xff]  ;;  %v2404_v5 = vld [vmem:[#allocation8 + $0x10] sm:$0xff]  ;;  %vm355_vm1 = vcmask 261120   ;;  %vm628_vm4 = vcmask 64512   ;;  %vm892_vm11 = vcmask 130048  }
  0x7c   : > { %1738 = vmatpush3.msra.mxu1 %v2393_v1  ;;  %1726 = vmatprep.subr.mxu0 %v2398_v3  ;;  %v2408_v6 = vld [vmem:[#allocation8 + $0x8] sm:$0xff]  ;;  %v2411_v7 = vld [vmem:[#allocation7] sm:$0xff]  ;;  %v2416_v8 = vld [vmem:[%s2368_s18] sm:$0xff]  ;;  %s1676_s16 = sshll.u32 %s2204_s25, 7  ;;  %s335_s9 = scalar_lea.vmem [#allocation10], %s1658_s8 }
  0x7d   : > { %1739 = vmatprep.subr.mxu1 %v2145_v0  ;;  %1727 = vmatpush3.msra.mxu0 %v2398_v3  ;;  %v2419_v9 = vld [vmem:[#allocation8] sm:$0xff]  ;;  %v2429_v11 = vld [vmem:[%s2376_s26 + $0x8] sm:$0xff]  ;;  %v2450_v12 = vld [vmem:[%s2597_s3] ss:$0 sm:$0xff]  ;;  %s1535_s20 = sshll.u32 %s335_s9, 4  ;;  %s1533_s15 = scalar_lea.hbm %s2600_s6, %s1676_s16  ;;  %s1536_s20 = int_to_ptr.vmem [resolvable:$true] %s1535_s20 }
  0x7e   : > { %1740 = vmatpush3.msra.mxu1 %v2395_v2  ;;  %1728 = vmatprep.subr.mxu0 %v2404_v5  ;;  %v2424_v10 = vld [vmem:[%s2376_s26] sm:$0xff]  ;;  %s1522_s18 = scalar_lea.sflag [#allocation4], %s2362_s12  ;;  %s2061_s0 = scalar_lea.vmem %s1536_s20, 128 }
  0x7f   : > { %1741 = vmatprep.subr.mxu1 %v2145_v0  ;;  %1729 = vmatpush3.msra.mxu0 %v2404_v5  ;;  %v2456_v18 = vld [vmem:[%s2599_s5] ss:$0 sm:$0xff]  ;;  %p2062_p0 = scmp.ne.s32.totalorder %s1536_s20, %s2061_s0  ;;  %p2625_p10 = scmp.ne.s32.totalorder %s2613_s30, 0 }
  0x80   : > { %1742 = vmatpush3.msra.mxu1 %v2401_v4  ;;  %1730 = vmatprep.subr.mxu0 %v2408_v6  ;;  %s2147_s29 = smov [#allocation10]  }
  0x81   : > { %1743 = vmatprep.subr.mxu1 %v2145_v0  ;;  %1731 = vmatpush3.msra.mxu0 %v2408_v6  ;;  %p2063_p3 = pnand %p2062_p0, %p2625_p10  ;;  %s2065_s25 = sshll.u32 %s2147_s29, 4  ;;  %s2066_s25 = int_to_ptr.vmem [resolvable:$false] %s2065_s25 }
  0x82   : > { %1744 = vmatpush3.msra.mxu1 %v2411_v7  ;;  %1732 = vmatprep.subr.mxu0 %v2419_v9  ;;  %s2067_s8 = scalar_lea.vmem %s2066_s25, 256  ;;  %p2068_p9 = scmp.lt.s32.totalorder %s1536_s20, %s2066_s25 }
  0x83   : > { %1746 = vmatmul.mubr.msk.f32.vlgmr.msra.gmra.mxu1 %vm355_vm1, %v2416_v8  ;;  %1733 = vmatpush3.msra.mxu0 %v2419_v9  ;;  %p2064_p11 = pneg %p2063_p3  ;;  %p2069_p13 = scmp.lt.s32.totalorder %s2067_s8, %s2061_s0 }
  0x84   : > { %1734 = vmatprep.mubr.msk.f32.mxu0 %vm355_vm1, %v2424_v10  ;;  %1748 = vmatprep.subr.mxu0 %v2145_v0 }
  0x85   : > { %1735 = vmatmul.mubr.msk.f32.vlgmr.msra.gmra.mxu0 %vm355_vm1, %v2429_v11  ;;  %1753 = vmatprep.subr.mxu1 %v2145_v0  ;;  %p2070_p1 = por %p2069_p13, %p2068_p9 }
  0x86   : > { %1750 = vmatprep.mubr.msk.f32.mxu0 %vm2146_vm0, %v2145_v0  ;;  %1754 = vmatpush3.msra.mxu1 %v2416_v8 }
  0x87   : > { %1755 = vmatprep.mubr.msk.f32.mxu1 %vm2146_vm0, %v2145_v0  ;;  %1769 = vmatprep.subr.mxu1 %v2145_v0  ;;  %p2071_p4 = pnand %p2070_p1, %p2064_p11 }
 0x143   : > { %v538_v13 = vpop.f32.mrf.mxu1 }
 0x144   : > { %v539_v14 = vadd.f32 %v2450_v12, %v538_v13 }
 0x145   : > { %v1747_v15 = vpop.f32.mrf.mxu1  ;;  %v1736_v17 = vpop.f32.mrf.mxu0 }
 0x146   : > { %v542_v16 = vmul.f32 %v539_v14, %v539_v14  ;;  %v2459_v19 = vadd.f32 %v1736_v17, %v2456_v18 }
 0x147   : > { %v428_v20 = vpop.f32.mrf.mxu0 }
 0x148   : > { %543 = vadd.xlane.f32.xlu0 %v542_v16  ;;  %v2462_v21 = vadd.f32 %v2456_v18, %v428_v20  ;;  %v438_v22 = vmul.f32 %v2459_v19, %v2459_v19 }
 0x14a   : > { %441 = vadd.xlane.f32.xlu1 %v438_v22  ;;  %v437_v23 = vmul.f32 %v2462_v21, %v2462_v21 }
 0x14e   : > { %439 = vadd.xlane.f32.xlu1 %v437_v23 }
 0x1d1   : > { %v544_v24 = vpop.xlane.xlu0 %543 }
 0x1d2   : > { %1905 = vrsqrt.f32 %v544_v24  ;;  %vm547_vm2 = vcmp.eq.f32.partialorder %v544_v24, inf  ;;  %v550_v27 = vand.u32 2147483648, %v544_v24  ;;  %vm549_vm3 = vcmp.eq.f32.partialorder %v544_v24, 0.0 }
 0x1d3   : > { %v442_v39 = vpop.xlane.xlu1 %441 }
 0x1d4   : > { %vm452_vm5 = vcmp.eq.f32.partialorder %v442_v39, inf  ;;  %v455_v44 = vand.u32 2147483648, %v442_v39  ;;  %vm454_vm6 = vcmp.eq.f32.partialorder %v442_v39, 0.0 }
 0x1d7   : > { %v440_v40 = vpop.xlane.xlu1 %439 }
 0x1d8   : > { %vm445_vm7 = vcmp.eq.f32.partialorder %v440_v40, inf  ;;  %v448_v48 = vand.u32 2147483648, %v440_v40  ;;  %vm447_vm8 = vcmp.eq.f32.partialorder %v440_v40, 0.0 }
 0x1df   : > { %v1906_v25 = vpop.eup %1905 }
 0x1e0   : > { %v546_v26 = vmul.f32 %v1906_v25, %v544_v24 }
 0x1e2   : > { %v548_v28 = vsel %vm547_vm2, %v544_v24, %v546_v26 }
 0x1e3   : > { %v551_v29 = vsel %vm549_vm3, %v550_v27, %v548_v28 }
 0x1e4   : > { %v552_v30 = vmax.f32 %v551_v29, 1e-12 }
 0x1e6   : > { %1907 = vrcp.f32 %v552_v30 }
 0x1f3   : > { %v1908_v31 = vpop.eup %1907 }
 0x1f4   : > { %v554_v32 = vmul.f32 %v1908_v31, %v539_v14 }
 0x1f6   : > { %1749 = vmatpush3.xpose.msra.mxu0 %v554_v32 }
 0x1f7   : > { %1758 = vmatprep.subr.mxu0 %v2145_v0 }
 0x1f9   : > { %1751 = vmatmul.mubr.f32.vlgmr.msra.gmra.mxu0 %v554_v32 }
 0x1fa   : > { %1759 = vmatpush3.msra.mxu0 %v2398_v3  ;;  %1766 = vmatprep.mubr.msk.f32.mxu0 %vm2146_vm0, %v2145_v0 }
 0x1fb   : > { %1760 = vmatprep.subr.mxu0 %v2145_v0 }
 0x1fc   : > { %1761 = vmatpush3.msra.mxu0 %v2404_v5 }
 0x1fd   : > { %1762 = vmatprep.subr.mxu0 %v2145_v0 }
 0x1fe   : > { %1763 = vmatpush3.msra.mxu0 %v2408_v6 }
 0x1ff   : > { %1764 = vmatprep.subr.mxu0 %v2145_v0 }
 0x200   : > { %1765 = vmatpush3.msra.mxu0 %v2419_v9 }
 0x201   : > { %1776 = vmatprep.subr.mxu0 %v2145_v0 }
 0x2b9   : > { %v621_v33 = vpop.f32.mrf.mxu0 }
 0x2ba   : > { %v625_v34 = vmul.f32 30.0, %v621_v33 }
 0x2bb   : > { %v1752_v35 = vpop.f32.mrf.mxu0 }
 0x2bc   : > { %v626_v36 = vmul.f32 1.442695, %v625_v34 }
 0x2be   : > { %1909 = vpow2.f32 %v626_v36 }
 0x2bf   : > { %1911 = vrsqrt.f32 %v442_v39 }
 0x2c0   : > { %1913 = vrsqrt.f32 %v440_v40 }
 0x2cb   : > { %v1910_v37 = vpop.eup %1909 }
 0x2cc   : > { %v629_v38 = vsel %vm628_vm4, %v1910_v37, 0.0  ;;  %v1912_v41 = vpop.eup %1911 }
 0x2cd   : > { %630 = vadd.xlane.f32.xlu0 %v629_v38  ;;  %v451_v42 = vmul.f32 %v1912_v41, %v442_v39  ;;  %v1914_v43 = vpop.eup %1913 }
 0x2ce   : > { %v444_v46 = vmul.f32 %v1914_v43, %v440_v40 }
 0x2cf   : > { %v453_v45 = vsel %vm452_vm5, %v442_v39, %v451_v42 }
 0x2d0   : > { %v456_v47 = vsel %vm454_vm6, %v455_v44, %v453_v45  ;;  %v446_v49 = vsel %vm445_vm7, %v440_v40, %v444_v46 }
 0x2d1   : > { %v458_v50 = vmax.f32 %v456_v47, 1e-12  ;;  %v449_v51 = vsel %vm447_vm8, %v448_v48, %v446_v49 }
 0x2d2   : > { %v457_v52 = vmax.f32 %v449_v51, 1e-12 }
 0x2d3   : > { %1915 = vrcp.f32 %v458_v50 }
 0x2e0   : > { %v1916_v54 = vpop.eup %1915 }
 0x2e1   : > { %v2481_v57 = vmul.f32 %v1916_v54, %v2459_v19 }
 0x356   : > { %v631_v53 = vpop.xlane.xlu0 %630 }
 0x357   : > { %1917 = vrcp.f32 %v631_v53 }
 0x358   : > { %1919 = vrcp.f32 %v457_v52 }
 0x364   : > { %v1918_v55 = vpop.eup %1917 }
 0x365   : > { %v633_v56 = vmul.f32 %v1918_v55, %v1910_v37  ;;  %v1920_v58 = vpop.eup %1919 }
 0x366   : > { %v2489_v59 = vmul.f32 %v1920_v58, %v2462_v21 }
 0x367   : > { %1756 = vmatmul.mubr.msk.f32.vlgmr.msra.gmra.mxu1 %vm628_vm4, %v633_v56 }
 0x368   : > { %1770 = vmatpush3.xpose.msra.mxu1 %v2481_v57  ;;  %1773 = vmatprep.mubr.msk.f32.mxu1 %vm2146_vm0, %v2145_v0 }
 0x369   : > { %1771 = vmatprep.subr.mxu1 %v2145_v0 }
 0x36c   : > { %1772 = vmatpush3.xpose.msra.mxu1 %v2489_v59 }
 0x36d   : > { %1783 = vmatprep.subr.mxu1 %v2145_v0 }
 0x427   : > { %v703_v60 = vpop.f32.mrf.mxu1 }
 0x428   : > { %v707_v61 = vadd.f32 %v703_v60, %v2416_v8 }
 0x429   : > { %v1757_v62 = vpop.f32.mrf.mxu1 }
 0x42a   : > { %v708_v63 = vsel %vm355_vm1, %v707_v61, 0.0  ;;  %v717_v13 = vmul.f32 %v707_v61, %v707_v61 }
 0x42b   : > { %v709_v14 = vrot.slane %v708_v63, 4 }
 0x42c   : > { %v718_v15 = vsel %vm355_vm1, %v717_v13, 0.0 }
 0x42d   : > { %v710_v16 = vadd.f32 %v709_v14, %v708_v63  ;;  %v719_v17 = vrot.slane %v718_v15, 4 }
 0x42f   : > { %v711_v19 = vrot.slane %v710_v16, 2  ;;  %v720_v20 = vadd.f32 %v719_v17, %v718_v15 }
 0x431   : > { %v712_v21 = vadd.f32 %v711_v19, %v710_v16  ;;  %v721_v22 = vrot.slane %v720_v20, 2 }
 0x433   : > { %v713_v23 = vrot.slane %v712_v21, 1  ;;  %v722_v24 = vadd.f32 %v721_v22, %v720_v20 }
 0x435   : > { %v714_v25 = vadd.f32 %v713_v23, %v712_v21  ;;  %v723_v26 = vrot.slane %v722_v24, 1 }
 0x437   : > { %v716_v27 = vmul.f32 0.125, %v714_v25  ;;  %v724_v28 = vadd.f32 %v723_v26, %v722_v24 }
 0x439   : > { %v725_v8 = vmul.f32 0.125, %v724_v28  ;;  %v726_v29 = vmul.f32 %v716_v27, %v716_v27  ;;  %v728_v32 = vsub.f32 %v707_v61, %v716_v27 }
 0x43b   : > { %v727_v30 = vsub.f32 %v725_v8, %v726_v29 }
 0x43d   : > { %v729_v31 = vadd.f32 1e-05, %v727_v30 }
 0x43f   : > { %1921 = vrsqrt.f32 %v729_v31 }
 0x44c   : > { %v1922_v33 = vpop.eup %1921 }
 0x44d   : > { %v731_v34 = vmul.f32 %v1922_v33, %v728_v32 }
 0x44f   : > { %v732_v35 = vmax.f32 %v731_v34, 0.0 }
 0x451   : > { %1767 = vmatmul.mubr.msk.f32.vlgmr.msra.gmra.mxu0 %vm355_vm1, %v732_v35 }
 0x452   : > { %1777 = vmatpush3.msra.mxu0 %v2429_v11  ;;  %1780 = vmatprep.mubr.msk.f32.mxu0 %vm2146_vm0, %v2145_v0 }
 0x453   : > { %1778 = vmatprep.subr.mxu0 %v2145_v0 }
 0x454   : > { %1779 = vmatpush3.msra.mxu0 %v2424_v10 }
 0x455   : > { %1794 = vmatprep.subr.mxu0 %v2145_v0 }
 0x511   : > { %v802_v36 = vpop.f32.mrf.mxu0 }
 0x512   : > { %v803_v37 = vadd.f32 %v2456_v18, %v802_v36 }
 0x513   : > { %v1768_v38 = vpop.f32.mrf.mxu0 }
 0x514   : > { %v806_v39 = vmul.f32 %v803_v37, %v803_v37 }
 0x516   : > { %807 = vadd.xlane.f32.xlu0 %v806_v39 }
 0x59f   : > { %v808_v40 = vpop.xlane.xlu0 %807 }
 0x5a0   : > { %1923 = vrsqrt.f32 %v808_v40  ;;  %vm811_vm9 = vcmp.eq.f32.partialorder %v808_v40, inf  ;;  %v814_v43 = vand.u32 2147483648, %v808_v40  ;;  %vm813_vm10 = vcmp.eq.f32.partialorder %v808_v40, 0.0 }
 0x5ad   : > { %v1924_v41 = vpop.eup %1923 }
 0x5ae   : > { %v810_v42 = vmul.f32 %v1924_v41, %v808_v40 }
 0x5b0   : > { %v812_v44 = vsel %vm811_vm9, %v808_v40, %v810_v42 }
 0x5b1   : > { %v815_v45 = vsel %vm813_vm10, %v814_v43, %v812_v44 }
 0x5b2   : > { %v816_v46 = vmax.f32 %v815_v45, 1e-12 }
 0x5b4   : > { %1925 = vrcp.f32 %v816_v46 }
 0x5c1   : > { %v1926_v47 = vpop.eup %1925 }
 0x5c2   : > { %v818_v48 = vmul.f32 %v1926_v47, %v803_v37 }
 0x5c4   : > { %1774 = vmatmul.mubr.f32.vlgmr.msra.gmra.mxu1 %v818_v48 }
 0x5c5   : > { %1784 = vmatpush3.msra.mxu1 %v2393_v1  ;;  %1791 = vmatprep.mubr.msk.f32.mxu1 %vm2146_vm0, %v2145_v0 }
 0x5c6   : > { %1785 = vmatprep.subr.mxu1 %v2145_v0 }
 0x5c7   : > { %1786 = vmatpush3.msra.mxu1 %v2395_v2 }
 0x5c8   : > { %1787 = vmatprep.subr.mxu1 %v2145_v0 }
 0x5c9   : > { %1788 = vmatpush3.msra.mxu1 %v2401_v4 }
 0x5ca   : > { %1789 = vmatprep.subr.mxu1 %v2145_v0 }
 0x5cb   : > { %1790 = vmatpush3.msra.mxu1 %v2411_v7 }
 0x5cc   : > { %1804 = vmatprep.subr.mxu1 %v2145_v0 }
 0x684   : > { %v885_v49 = vpop.f32.mrf.mxu1 }
 0x685   : > { %v889_v50 = vmul.f32 30.0, %v885_v49 }
 0x686   : > { %v1775_v1 = vpop.f32.mrf.mxu1 }
 0x687   : > { %v890_v51 = vmul.f32 1.442695, %v889_v50 }
 0x689   : > { %1927 = vpow2.f32 %v890_v51 }
 0x696   : > { %v1928_v52 = vpop.eup %1927 }
 0x697   : > { %v893_v53 = vsel %vm892_vm11, %v1928_v52, 0.0 }
 0x698   : > { %894 = vadd.xlane.f32.xlu1 %v893_v53 }
 0x721   : > { %v895_v2 = vpop.xlane.xlu1 %894 }
 0x722   : > { %1929 = vrcp.f32 %v895_v2 }
 0x72f   : > { %v1930_v54 = vpop.eup %1929 }
 0x730   : > { %v897_v4 = vmul.f32 %v1930_v54, %v1928_v52 }
 0x732   : > { %1781 = vmatmul.mubr.msk.f32.vlgmr.msra.gmra.mxu0 %vm892_vm11, %v897_v4 }
 0x733   : > { %1796 = vmatprep.mubr.msk.f32.mxu0 %vm2146_vm0, %v2145_v0 }
 0x7f2   : > { %v967_v7 = vpop.f32.mrf.mxu0 }
 0x7f3   : > { %v971_v55 = vadd.f32 %v967_v7, %v732_v35 }
 0x7f4   : > { %v1782_v56 = vpop.f32.mrf.mxu0 }
 0x7f5   : > { %v972_v58 = vsel %vm355_vm1, %v971_v55, 0.0  ;;  %v980_v60 = vmul.f32 %v971_v55, %v971_v55 }
 0x7f6   : > { %v973_v61 = vrot.slane %v972_v58, 4 }
 0x7f7   : > { %v981_v62 = vsel %vm355_vm1, %v980_v60, 0.0 }
 0x7f8   : > { %v974_v63 = vadd.f32 %v973_v61, %v972_v58  ;;  %v982_v13 = vrot.slane %v981_v62, 4 }
 0x7fa   : > { %v975_v14 = vrot.slane %v974_v63, 2  ;;  %v983_v15 = vadd.f32 %v982_v13, %v981_v62 }
 0x7fc   : > { %v976_v16 = vadd.f32 %v975_v14, %v974_v63  ;;  %v984_v17 = vrot.slane %v983_v15, 2 }
 0x7fe   : > { %v977_v19 = vrot.slane %v976_v16, 1  ;;  %v985_v20 = vadd.f32 %v984_v17, %v983_v15 }
 0x800   : > { %v978_v21 = vadd.f32 %v977_v19, %v976_v16  ;;  %v986_v22 = vrot.slane %v985_v20, 1 }
 0x802   : > { %v979_v23 = vmul.f32 0.125, %v978_v21  ;;  %v987_v24 = vadd.f32 %v986_v22, %v985_v20 }
 0x804   : > { %v988_v25 = vmul.f32 0.125, %v987_v24  ;;  %v989_v26 = vmul.f32 %v979_v23, %v979_v23  ;;  %v991_v8 = vsub.f32 %v971_v55, %v979_v23 }
 0x806   : > { %v990_v27 = vsub.f32 %v988_v25, %v989_v26 }
 0x808   : > { %v992_v28 = vadd.f32 1e-05, %v990_v27 }
 0x80a   : > { %1931 = vrsqrt.f32 %v992_v28 }
 0x817   : > { %v1932_v29 = vpop.eup %1931 }
 0x818   : > { %v994_v30 = vmul.f32 %v1932_v29, %v991_v8 }
 0x81a   : > { %v995_v31 = vmax.f32 %v994_v30, 0.0 }
 0x81c   : > { %1792 = vmatmul.mubr.msk.f32.vlgmr.msra.gmra.mxu1 %vm355_vm1, %v995_v31 }
 0x81d   : > { %1805 = vmatpush3.msra.mxu1 %v2398_v3  ;;  %1812 = vmatprep.mubr.msk.f32.mxu1 %vm2146_vm0, %v2145_v0 }
 0x81e   : > { %1806 = vmatprep.subr.mxu1 %v2145_v0 }
 0x81f   : > { %1807 = vmatpush3.msra.mxu1 %v2404_v5 }
 0x820   : > { %1808 = vmatprep.subr.mxu1 %v2145_v0 }
 0x821   : > { %1809 = vmatpush3.msra.mxu1 %v2408_v6 }
 0x822   : > { %1810 = vmatprep.subr.mxu1 %v2145_v0 }
 0x823   : > { %1811 = vmatpush3.msra.mxu1 %v2419_v9 }
 0x824   : > { %1822 = vmatprep.subr.mxu1 %v2145_v0 }
 0x8dc   : > { %v1065_v32 = vpop.f32.mrf.mxu1 }
 0x8dd   : > { %v1066_v3 = vadd.f32 %v2450_v12, %v1065_v32 }
 0x8de   : > { %v1793_v33 = vpop.f32.mrf.mxu1 }
 0x8df   : > { %v1069_v34 = vmul.f32 %v1066_v3, %v1066_v3 }
 0x8e1   : > { %1070 = vadd.xlane.f32.xlu0 %v1069_v34 }
 0x96a   : > { %v1071_v35 = vpop.xlane.xlu0 %1070 }
 0x96b   : > { %1933 = vrsqrt.f32 %v1071_v35  ;;  %vm1074_vm12 = vcmp.eq.f32.partialorder %v1071_v35, inf  ;;  %v1077_v37 = vand.u32 2147483648, %v1071_v35  ;;  %vm1076_vm13 = vcmp.eq.f32.partialorder %v1071_v35, 0.0 }
 0x978   : > { %v1934_v36 = vpop.eup %1933 }
 0x979   : > { %v1073_v5 = vmul.f32 %v1934_v36, %v1071_v35 }
 0x97b   : > { %v1075_v38 = vsel %vm1074_vm12, %v1071_v35, %v1073_v5 }
 0x97c   : > { %v1078_v6 = vsel %vm1076_vm13, %v1077_v37, %v1075_v38 }
 0x97d   : > { %v1079_v39 = vmax.f32 %v1078_v6, 1e-12 }
 0x97f   : > { %1935 = vrcp.f32 %v1079_v39 }
 0x98c   : > { %v1936_v9 = vpop.eup %1935 }
 0x98d   : > { %v1081_v40 = vmul.f32 %v1936_v9, %v1066_v3 }
 0x98f   : > { %1795 = vmatpush3.xpose.msra.mxu0 %v1081_v40 }
 0x990   : > { %1799 = vmatprep.subr.mxu0 %v2145_v0 }
 0x992   : > { %1797 = vmatmul.mubr.f32.vlgmr.msra.gmra.mxu0 %v1081_v40 }
 0x993   : > { %1800 = vmatpush3.msra.mxu0 %v995_v31  ;;  %1801 = vmatprep.mubr.msk.f32.mxu0 %vm2146_vm0, %v2145_v0 }
 0x994   : > { %1815 = vmatprep.subr.mxu0 %v2145_v0 }
 0xa52   : > { %v1148_v12 = vpop.f32.mrf.mxu0 }
 0xa53   : > { %v1152_v41 = vmul.f32 30.0, %v1148_v12 }
 0xa54   : > { %v1798_v42 = vpop.f32.mrf.mxu0 }
 0xa55   : > { %v1153_v43 = vmul.f32 1.442695, %v1152_v41 }
 0xa57   : > { %1937 = vpow2.f32 %v1153_v43 }
 0xa64   : > { %v1938_v44 = vpop.eup %1937 }
 0xa65   : > { %v1155_v45 = vsel %vm628_vm4, %v1938_v44, 0.0 }
 0xa66   : > { %1156 = vadd.xlane.f32.xlu1 %v1155_v45 }
 0xaef   : > { %v1157_v46 = vpop.xlane.xlu1 %1156 }
 0xaf0   : > { %1939 = vrcp.f32 %v1157_v46 }
 0xafd   : > { %v1940_v47 = vpop.eup %1939 }
 0xafe   : > { %v1159_v48 = vmul.f32 %v1940_v47, %v1938_v44 }
 0xb00   : > { %1802 = vmatmul.mubr.msk.f32.vlgmr.msra.gmra.mxu0 %vm628_vm4, %v1159_v48 }
 0xb01   : > { %1816 = vmatpush3.xpose.msra.mxu0 %v2481_v57  ;;  %1819 = vmatprep.mubr.msk.f32.mxu0 %vm2146_vm0, %v2145_v0 }
 0xb02   : > { %1817 = vmatprep.subr.mxu0 %v2145_v0 }
 0xb05   : > { %1818 = vmatpush3.xpose.msra.mxu0 %v2489_v59 }
 0xbc0   : > { %v1229_v49 = vpop.f32.mrf.mxu0 }
 0xbc1   : > { %v1233_v50 = vadd.f32 %v1229_v49, %v995_v31 }
 0xbc2   : > { %v1803_v1 = vpop.f32.mrf.mxu0 }
 0xbc3   : > { %v1234_v51 = vsel %vm355_vm1, %v1233_v50, 0.0  ;;  %v1242_v52 = vmul.f32 %v1233_v50, %v1233_v50 }
 0xbc4   : > { %v1235_v53 = vrot.slane %v1234_v51, 4 }
 0xbc5   : > { %v1243_v2 = vsel %vm355_vm1, %v1242_v52, 0.0 }
 0xbc6   : > { %v1236_v54 = vadd.f32 %v1235_v53, %v1234_v51  ;;  %v1244_v4 = vrot.slane %v1243_v2, 4 }
 0xbc8   : > { %v1237_v7 = vrot.slane %v1236_v54, 2  ;;  %v1245_v57 = vadd.f32 %v1244_v4, %v1243_v2 }
 0xbca   : > { %v1238_v55 = vadd.f32 %v1237_v7, %v1236_v54  ;;  %v1246_v56 = vrot.slane %v1245_v57, 2 }
 0xbcc   : > { %v1239_v58 = vrot.slane %v1238_v55, 1  ;;  %v1247_v60 = vadd.f32 %v1246_v56, %v1245_v57 }
 0xbce   : > { %v1240_v61 = vadd.f32 %v1239_v58, %v1238_v55  ;;  %v1248_v62 = vrot.slane %v1247_v60, 1 }
 0xbd0   : > { %v1241_v59 = vmul.f32 0.125, %v1240_v61  ;;  %v1249_v63 = vadd.f32 %v1248_v62, %v1247_v60 }
 0xbd2   : > { %v1250_v13 = vmul.f32 0.125, %v1249_v63  ;;  %v1251_v14 = vmul.f32 %v1241_v59, %v1241_v59  ;;  %v1253_v17 = vsub.f32 %v1233_v50, %v1241_v59 }
 0xbd4   : > { %v1252_v15 = vsub.f32 %v1250_v13, %v1251_v14 }
 0xbd6   : > { %v1254_v16 = vadd.f32 1e-05, %v1252_v15 }
 0xbd8   : > { %1941 = vrsqrt.f32 %v1254_v16 }
 0xbe5   : > { %v1942_v19 = vpop.eup %1941 }
 0xbe6   : > { %v1256_v20 = vmul.f32 %v1942_v19, %v1253_v17 }
 0xbe8   : > { %v1257_v21 = vmax.f32 %v1256_v20, 0.0 }
 0xbea   : > { %1813 = vmatmul.mubr.msk.f32.vlgmr.msra.gmra.mxu1 %vm355_vm1, %v1257_v21 }
 0xbeb   : > { %1823 = vmatpush3.msra.mxu1 %v2429_v11  ;;  %1826 = vmatprep.mubr.msk.f32.mxu1 %vm2146_vm0, %v2145_v0 }
 0xbec   : > { %1824 = vmatprep.subr.mxu1 %v2145_v0 }
 0xbed   : > { %1825 = vmatpush3.msra.mxu1 %v2424_v10 }
 0xcaa   : > { %v1327_v22 = vpop.f32.mrf.mxu1 }
 0xcab   : > { %v1328_v23 = vadd.f32 %v2456_v18, %v1327_v22 }
 0xcac   : > { %v1814_v24 = vpop.f32.mrf.mxu1 }
 0xcad   : > { %v1331_v25 = vmul.f32 %v1328_v23, %v1328_v23 }
 0xcaf   : > { %1332 = vadd.xlane.f32.xlu0 %v1331_v25 }
 0xd38   : > { %v1333_v26 = vpop.xlane.xlu0 %1332 }
 0xd39   : > { %1943 = vrsqrt.f32 %v1333_v26  ;;  %vm1336_vm14 = vcmp.eq.f32.partialorder %v1333_v26, inf  ;;  %v1339_v8 = vand.u32 2147483648, %v1333_v26  ;;  %vm1338_vm15 = vcmp.eq.f32.partialorder %v1333_v26, 0.0 }
 0xd46   : > { %v1944_v27 = vpop.eup %1943 }
 0xd47   : > { %v1335_v28 = vmul.f32 %v1944_v27, %v1333_v26 }
 0xd49   : > { %v1337_v11 = vsel %vm1336_vm14, %v1333_v26, %v1335_v28 }
 0xd4a   : > { %v1340_v29 = vsel %vm1338_vm15, %v1339_v8, %v1337_v11 }
 0xd4b   : > { %v1341_v30 = vmax.f32 %v1340_v29, 1e-12 }
 0xd4d   : > { %1945 = vrcp.f32 %v1341_v30 }
 0xd5a   : > { %v1946_v0 = vpop.eup %1945 }
 0xd5b   : > { %v1343_v31 = vmul.f32 %v1946_v0, %v1328_v23 }
 0xd5d   : > { %1820 = vmatmul.mubr.f32.vlgmr.msra.gmra.mxu0 %v1343_v31 }
 0xe1d   : > { %v1410_v10 = vpop.f32.mrf.mxu0 }
 0xe1e   : > { %v1414_v32 = vmul.f32 30.0, %v1410_v10 }
 0xe1f   : > { %v1821_v18 = vpop.f32.mrf.mxu0 }
 0xe20   : > { %v1415_v3 = vmul.f32 1.442695, %v1414_v32 }
 0xe22   : > { %1947 = vpow2.f32 %v1415_v3 }
 0xe2f   : > { %v1948_v33 = vpop.eup %1947 }
 0xe30   : > { %v1417_v34 = vsel %vm892_vm11, %v1948_v33, 0.0 }
 0xe31   : > { %1418 = vadd.xlane.f32.xlu1 %v1417_v34 }
 0xeba   : > { %v1419_v35 = vpop.xlane.xlu1 %1418 }
 0xebb   : > { %1949 = vrcp.f32 %v1419_v35 }
 0xec8   : > { %v1950_v36 = vpop.eup %1949 }
 0xec9   : > { %v1421_v5 = vmul.f32 %v1950_v36, %v1948_v33 }
 0xecb   : > { %1827 = vmatmul.mubr.msk.f32.vlgmr.msra.gmra.mxu1 %vm892_vm11, %v1421_v5 }
 0xf8b   : > { %v1491_v37 = vpop.f32.mrf.mxu1 }
 0xf8c   : > { %v1495_v38 = vadd.f32 %v1491_v37, %v1257_v21 }
 0xf8d   : > { %v1828_v6 = vpop.f32.mrf.mxu1 }
 0xf8e   : > { %v1496_v39 = vsel %vm355_vm1, %v1495_v38, 0.0  ;;  %v1504_v9 = vmul.f32 %v1495_v38, %v1495_v38 }
 0xf8f   : > { %v1497_v40 = vrot.slane %v1496_v39, 4 }
 0xf90   : > { %v1505_v12 = vsel %vm355_vm1, %v1504_v9, 0.0 }
 0xf91   : > { %v1498_v41 = vadd.f32 %v1497_v40, %v1496_v39  ;;  %v1506_v42 = vrot.slane %v1505_v12, 4 }
 0xf93   : > { %v1499_v43 = vrot.slane %v1498_v41, 2  ;;  %v1507_v44 = vadd.f32 %v1506_v42, %v1505_v12 }
 0xf95   : > { %v1500_v45 = vadd.f32 %v1499_v43, %v1498_v41  ;;  %v1508_v46 = vrot.slane %v1507_v44, 2 }
 0xf97   : > { %v1501_v47 = vrot.slane %v1500_v45, 1  ;;  %v1509_v48 = vadd.f32 %v1508_v46, %v1507_v44 }
 0xf99   : > { %v1502_v49 = vadd.f32 %v1501_v47, %v1500_v45  ;;  %v1510_v50 = vrot.slane %v1509_v48, 1 }
 0xf9b   : > { %v1503_v1 = vmul.f32 0.125, %v1502_v49  ;;  %v1511_v51 = vadd.f32 %v1510_v50, %v1509_v48 }
 0xf9d   : > { %v1512_v52 = vmul.f32 0.125, %v1511_v51  ;;  %v1513_v53 = vmul.f32 %v1503_v1, %v1503_v1  ;;  %v1515_v4 = vsub.f32 %v1495_v38, %v1503_v1 }
 0xf9f   : > { %v1514_v2 = vsub.f32 %v1512_v52, %v1513_v53 }
 0xfa1   : > { %v1516_v54 = vadd.f32 1e-05, %v1514_v2 }
 0xfa3   : > { %1951 = vrsqrt.f32 %v1516_v54 }
 0xfb0   : > { %v1952_v7 = vpop.eup %1951 }
 0xfb1   : > { %v1518_v57 = vmul.f32 %v1952_v7, %v1515_v4 }
 0xfb3   : > { %v1519_v55 = vmax.f32 %v1518_v57, 0.0 }
 0xfb5   : > { %1520 = vst.msk [vmem:[%s335_s9] sm:$0xff] %vm355_vm1, %v1519_v55 }
 0xfb6   : > { %2074 = shalt.err (!%p2071_p4)
}
 0xfb7   : > { %s2075_s14 = scalar_lea.hbm %s1533_s15, 128  ;;  %s2079_s27 = scalar_lea.hbm %s2600_s6, 256 }
 0xfb8   : > { %p2076_p5 = scmp.ne.s32.totalorder %s1533_s15, %s2075_s14  ;;  %p2080_p2 = scmp.lt.s32.totalorder %s1533_s15, %s2600_s6 }
 0xfb9   : > { %p2081_p6 = scmp.lt.s32.totalorder %s2079_s27, %s2075_s14 }
 0xfba   : > { %p2077_p7 = pnand %p2076_p5, %p2625_p10 }
 0xfbb   : > { %p2082_p12 = por %p2081_p6, %p2080_p2 }
 0xfbc   : > { %p2078_p8 = pneg %p2077_p7 }
 0xfbe   : > { %p2083_p0 = pnand %p2082_p12, %p2078_p8 }
 0xfc0   : > { %2086 = shalt.err (!%p2083_p0)
}
 0xfc1   : > { %1841 = dma.vmem_to_hbm [thread:$0]  (%p2625_p10), %s1536_s20, 128, %s1533_s15, %s1522_s18  }
 0xfc2 PF: > { %s1547_s11 = sand.u32 1, %s2125_s21   ;;  %p2626_p3 = scmp.ne.s32.totalorder %s2609_s28, 0 }
 0xfc3   : > { %p2627_p11 = scmp.ge.s32.totalorder %s2137_s24, 2  ;;  %s1548_s16 = scalar_lea.sflag [#allocation4], %s1547_s11 }
 0xfc5   : > { %p1858_p9 = pnand %p2627_p11, %p2626_p3 }
 0xfc7   : > { %p1859_p13 = pneg %p1858_p9 }
 0xfc9   : > { %2120 = dma.done.wait (%p1859_p13), %s1548_s16, 128  }
 0xfca   : > { %2122 = vsyncadd (%p1859_p13), %s1548_s16, 4294967168  ;;  %p23_p1 = scmp.ge.s32.totalorder %s2261_s19, 4   ;;  %s2628_s21 = smov %s2129_s22 }
 0xfcb   : > { %s2629_s22 = smov %s2133_s23  ;;  %s2630_s23 = smov %s2277_s7 }
 0xfcc   : > { %s2631_s24 = smov %s2261_s19  ;;  %25 = sbr.rel (!%p23_p1) target bundleno = 11 (0xb), region = 110 }
 0xfd1   :  { %1553 = vsyncpa [#allocation3], 1 }
 0xfd2   :  { %1555 = vsyncpa [#allocation3 + $0x1], 1 }
 0xfd3   :  { %1556 = vsyncpa [#allocation6], 1 }
 0xfd4   :  { %1558 = vsyncpa [#allocation6 + $0x1], 1 }
 0xfd5   :  { %1559 = vsyncpa [#allocation9], 1 }
 0xfd6   :  { %1560 = vsyncpa [#allocation4], 1 }
 0xfd7   :  { %1562 = vsyncpa [#allocation4 + $0x1], 1 }

</bundles_post_ra>
